<compile_context>
chip_gen: v5e
topology: v5e:2x2
jax: 0.10.0
libtpu: 0.0.40
codegen_flags: <defaults>
</compile_context>

<pallas_src>
import jax
import jax.numpy as jnp
from jax.experimental import pallas as pl
from jax.experimental.pallas import tpu as pltpu

_MIB = 1024 * 1024


def _round_up(x, m):
    return ((x + m - 1) // m) * m


def _softplus(x):
    # Single-exp numerically stable softplus; matches torch.nn.Softplus within fp tolerance:
    # softplus(x) = max(x, 0) + log1p(exp(-|x|))
    return jnp.maximum(x, 0.0) + jnp.log1p(jnp.exp(-jnp.abs(x)))


def _sigmoid(x):
    # One EUP op (tanh) instead of exp + reciprocal; bounded in [0, 1].
    return 0.5 * (jnp.tanh(0.5 * x) + 1.0)


def _tpu_vmem_capacity_bytes():
    try:
        return int(pltpu.get_tpu_info().vmem_capacity_bytes)
    except Exception:
        return 64 * _MIB          # conservative (v7x-sized) fallback


def _make_decoder_kernel(n_cats, out_dtype):
    """Kernel factory. n_cats: tuple of category counts (>1) injected into layer 0."""
    n_cov = len(n_cats)

    def kernel(*refs):
        # ref layout: z, [idx], w0_z, wcat_0..wcat_{n_cov-1}, b0, w_heads, b_heads, out
        pos = 0
        z_ref = refs[pos]; pos += 1
        idx_ref = None
        if n_cov:
            idx_ref = refs[pos]; pos += 1
        w0_ref = refs[pos]; pos += 1
        wcat_refs = refs[pos:pos + n_cov]; pos += n_cov
        b0_ref = refs[pos]; pos += 1
        wh_ref = refs[pos]; pos += 1      # (3, n_hidden, tile_n)
        bh_ref = refs[pos]; pos += 1      # (3, 1, tile_n)
        out_ref = refs[pos]               # (3, tile_b, tile_n)

        w_dtype = w0_ref.dtype

        # FCLayers layer-0 linear on the latent part (MXU, f32 accumulation). Recomputed
        # per N-tile (a few % of the step's MXU work) so both grid axes stay carry-free.
        h = jnp.dot(z_ref[...].astype(w_dtype), w0_ref[...],
                    preferred_element_type=jnp.float32)
        h = h + b0_ref[...].astype(jnp.float32)

        # Covariate injection: one_hot(cat) @ W_cat is 100% sparse -> row-select of W_cat
        # via a static compare+select loop over the (tiny) category count.
        if n_cov:
            idx = idx_ref[...]                                    # (tile_b, n_cov) int32
            for v, (wc_ref, n_cat) in enumerate(zip(wcat_refs, n_cats)):
                wc = wc_ref[...].astype(jnp.float32)              # hoisted cast, (n_cat, n_hidden)
                idx_v = idx[:, v:v + 1]                           # (tile_b, 1)
                for c in range(n_cat):
                    h = h + jnp.where(idx_v == c, wc[c:c + 1, :], 0.0)

        h = jnp.maximum(h, 0.0)                                   # ReLU
        hk = h.astype(wh_ref.dtype)

        def head(k):
            o = jnp.dot(hk, wh_ref[k], preferred_element_type=jnp.float32)
            return o + bh_ref[k].astype(jnp.float32)

        # Epilogue in f32; cast only at the store (optionally bf16 writeback).
        out_ref[0] = _softplus(head(0)).astype(out_dtype)         # mu
        out_ref[1] = _sigmoid(head(1)).astype(out_dtype)          # pi
        out_ref[2] = _softplus(head(2)).astype(out_dtype)         # theta

    return kernel


def decoder_forward(z, cat_list, params, n_cat_list, n_output, *,
                    max_tile_b=256, max_tile_n=None, out_dtype=jnp.float32):
    """One fused pallas_call. Grid = (N tiles [outer], batch tiles [inner]); head weights
    and outputs stream per N tile, layer-0 weights stay VMEM-resident."""
    n_cats = tuple(c for c in n_cat_list if c > 1)       # FCLayers drops n_cat <= 1
    cats = [c for nc, c in zip(n_cat_list, cat_list) if nc > 1]
    n_cov = len(n_cats)
    assert len(params["w_cats"]) == n_cov

    B, n_input = z.shape
    n_hidden = params["w0_z"].shape[1]
    n_out_p = params["w_heads"].shape[2]                 # per-head width, multiple of 128
    cat_dim = sum(n_cats)

    vmem_cap = _tpu_vmem_capacity_bytes()
    if max_tile_n is None:
        # bigger lane tiles on 128-MiB-VMEM chips (v5e/v6e), tighter on v7x (64 MiB)
        max_tile_n = 2048 if vmem_cap >= 96 * _MIB else 1024
    vmem_limit = int(max(32 * _MIB, min(vmem_cap - 16 * _MIB, 112 * _MIB)))

    # Batch tiling: sublane-aligned for the output dtype, capped at ceil(B/2) so the batch
    # axis alone gives >=2 grid points (keeps both v7x TensorCores fed).
    sub = 16 if jnp.dtype(out_dtype).itemsize < 4 else 8
    tile_b = min(max_tile_b, _round_up(pl.cdiv(B, 2), sub))
    b_pad = _round_up(B, tile_b)
    grid_b = b_pad // tile_b

    # Lane tiling of the per-head output dim; pad heads so tile_n divides the padded width
    # exactly (every block full-sized, every store lane-dense; <= tile_n-128 waste).
    tile_n = min(max_tile_n, n_out_p)
    n_pad = _round_up(n_out_p, tile_n)
    grid_n = n_pad // tile_n
    w_heads, b_heads = params["w_heads"], params["b_heads"]
    if n_pad != n_out_p:
        w_heads = jnp.pad(w_heads, ((0, 0), (0, 0), (0, n_pad - n_out_p)))
        b_heads = jnp.pad(b_heads, ((0, 0), (0, 0), (0, n_pad - n_out_p)))

    z_p = jnp.pad(z.astype(jnp.float32), ((0, b_pad - B), (0, 0)))
    args = [z_p]
    in_specs = [pl.BlockSpec((tile_b, n_input), lambda n, b: (b, 0))]
    if n_cov:
        idx = jnp.stack([jnp.reshape(c, (-1,)).astype(jnp.int32) for c in cats], axis=1)
        args.append(jnp.pad(idx, ((0, b_pad - B), (0, 0))))
        in_specs.append(pl.BlockSpec((tile_b, n_cov), lambda n, b: (b, 0)))

    args += [params["w0_z"], *params["w_cats"], params["b0"], w_heads, b_heads]
    in_specs += [pl.BlockSpec(params["w0_z"].shape, lambda n, b: (0, 0))]
    in_specs += [pl.BlockSpec(w.shape, lambda n, b: (0, 0)) for w in params["w_cats"]]
    in_specs += [pl.BlockSpec(params["b0"].shape, lambda n, b: (0, 0)),
                 pl.BlockSpec((3, n_hidden, tile_n), lambda n, b: (0, 0, n)),
                 pl.BlockSpec((3, 1, tile_n), lambda n, b: (0, 0, n))]

    out_specs = pl.BlockSpec((3, tile_b, tile_n), lambda n, b: (0, b, n))
    out_shape = jax.ShapeDtypeStruct((3, b_pad, n_pad), out_dtype)

    in_bytes = sum(int(a.size) * a.dtype.itemsize for a in args)
    cost = pl.CostEstimate(
        flops=int(2 * b_pad * n_hidden * (n_input + cat_dim + 3 * n_pad)),
        transcendentals=int(5 * b_pad * n_pad),
        bytes_accessed=int(in_bytes + 3 * b_pad * n_pad * jnp.dtype(out_dtype).itemsize),
    )

    kernel = _make_decoder_kernel(n_cats, out_dtype)

    out = pl.pallas_call(
        kernel,
        grid=(grid_n, grid_b),
        in_specs=in_specs,
        out_specs=out_specs,
        out_shape=out_shape,
        compiler_params=pltpu.CompilerParams(
            dimension_semantics=("parallel", "parallel"),   # both axes carry-free
            vmem_limit_bytes=vmem_limit,
        ),
        cost_estimate=cost,
    )(*args)

    # Strip batch padding and per-head lane padding.
    return out[0, :B, :n_output], out[1, :B, :n_output], out[2, :B, :n_output]


def init_params(key, n_input, n_hidden, n_output, n_cat_list, dtype=jnp.bfloat16):
    """Deterministic init mirroring torch Linear (uniform +-1/sqrt(fan_in)).
    Layer-0 weight stored split (z block + one block per covariate), pre-transposed to
    (in, out). Head weights stacked (3, n_hidden, n_out_p) in [mu, pi, theta] order, each
    head zero-padded to a multiple of 128 lanes. bf16 storage is the default (the kernel
    accumulates in f32 and keeps the epilogue f32); pass dtype=jnp.float32 for exact parity."""
    n_cats = [c for c in n_cat_list if c > 1]
    cat_dim = sum(n_cats)
    fan_in0 = n_input + cat_dim
    n_out_p = _round_up(n_output, 128)

    ks = list(jax.random.split(key, 2 + len(n_cats) + 6))

    def u(k, shape, bound):
        return jax.random.uniform(k, shape, jnp.float32, -bound, bound)

    b0_ = 1.0 / (fan_in0 ** 0.5)
    w0_z = u(ks[0], (n_input, n_hidden), b0_)
    b0 = u(ks[1], (1, n_hidden), b0_)
    w_cats = tuple(u(ks[2 + i], (c, n_hidden), b0_) for i, c in enumerate(n_cats))

    bh_ = 1.0 / (n_hidden ** 0.5)
    head_w, head_b = [], []
    base = 2 + len(n_cats)
    for j in range(3):
        w = u(ks[base + 2 * j], (n_hidden, n_output), bh_)
        b = u(ks[base + 2 * j + 1], (1, n_output), bh_)
        head_w.append(jnp.pad(w, ((0, 0), (0, n_out_p - n_output))))
        head_b.append(jnp.pad(b, ((0, 0), (0, n_out_p - n_output))))
    w_heads = jnp.stack(head_w, axis=0)    # (3, n_hidden, n_out_p)
    b_heads = jnp.stack(head_b, axis=0)    # (3, 1, n_out_p)

    cast = lambda a: a.astype(dtype)
    return dict(w0_z=cast(w0_z), w_cats=tuple(cast(w) for w in w_cats), b0=cast(b0),
                w_heads=cast(w_heads), b_heads=cast(b_heads))


def reference_forward(z, cat_list, params, n_cat_list, n_output):
    """Pure-JAX reference with the original one_hot + concat formulation."""
    pieces = [z]
    for n_cat, cat in zip(n_cat_list, cat_list):
        if n_cat > 1:
            pieces.append(jax.nn.one_hot(jnp.reshape(cat, (-1,)), n_cat, dtype=jnp.float32))
    x = jnp.concatenate(pieces, axis=-1)
    w0 = jnp.concatenate((params["w0_z"],) + tuple(params["w_cats"]), axis=0).astype(jnp.float32)
    h = jnp.maximum(x @ w0 + params["b0"].astype(jnp.float32), 0.0)
    wh = params["w_heads"].astype(jnp.float32)
    bh = params["b_heads"].astype(jnp.float32)
    outs = [h @ wh[k] + bh[k] for k in range(3)]
    mu = jax.nn.softplus(outs[0][:, :n_output])
    pi = jax.nn.sigmoid(outs[1][:, :n_output])
    th = jax.nn.softplus(outs[2][:, :n_output])
    return mu, pi, th


if __name__ == "__main__":
    key = jax.random.PRNGKey(0)

    # Small shapes consistent with the module; B=32 gives a 2-point batch grid so the
    # multi-step pipelined / megacore path is exercised even at demo scale.
    B = 32
    n_input = 32         # latent dim z
    n_hidden = 128
    n_output = 64        # number of genes (each head padded to 128 lanes inside)
    n_cat_list = [2, 3]  # two categorical covariates

    k_z, k_c0, k_c1, k_p = jax.random.split(key, 4)
    z = jax.random.normal(k_z, (B, n_input), dtype=jnp.float32)
    cat0 = jax.random.randint(k_c0, (B, 1), 0, n_cat_list[0])
    cat1 = jax.random.randint(k_c1, (B, 1), 0, n_cat_list[1])
    cat_list = (cat0, cat1)

    # f32 weights / f32 outputs: exact parity with the PyTorch module.
    params = init_params(k_p, n_input, n_hidden, n_output, n_cat_list, dtype=jnp.float32)
    mu, pi, theta = decoder_forward(z, cat_list, params, n_cat_list, n_output,
                                    out_dtype=jnp.float32)
    jax.block_until_ready((mu, pi, theta))

    mu_r, pi_r, th_r = reference_forward(z, cat_list, params, n_cat_list, n_output)
    assert mu.shape == (B, n_output) and pi.shape == (B, n_output) and theta.shape == (B, n_output)
    assert bool(jnp.allclose(mu, mu_r, rtol=2e-3, atol=2e-3))
    assert bool(jnp.allclose(pi, pi_r, rtol=2e-3, atol=2e-3))
    assert bool(jnp.allclose(theta, th_r, rtol=2e-3, atol=2e-3))
    assert bool(jnp.all(mu >= 0)) and bool(jnp.all(theta >= 0))
    assert bool(jnp.all((pi >= -1e-6) & (pi <= 1.0 + 1e-6)))   # tanh-form sigmoid, tiny HW slack

    # Default (bf16 weight storage) + bf16 outputs: halves weight DMA and halves output
    # writeback (the dominant HBM traffic at realistic gene counts). f32 accumulation and
    # f32 epilogue math stay inside the kernel.
    params_bf16 = init_params(k_p, n_input, n_hidden, n_output, n_cat_list)   # bf16 default
    mu16, pi16, th16 = decoder_forward(z, cat_list, params_bf16, n_cat_list, n_output,
                                       out_dtype=jnp.bfloat16)
    jax.block_until_ready((mu16, pi16, th16))
    assert mu16.shape == (B, n_output) and mu16.dtype == jnp.bfloat16
    mu16f, pi16f, th16f = (a.astype(jnp.float32) for a in (mu16, pi16, th16))
    assert bool(jnp.all(jnp.isfinite(mu16f))) and bool(jnp.all(mu16f >= 0))
    assert bool(jnp.all(th16f >= 0))
    assert bool(jnp.all((pi16f >= -1e-6) & (pi16f <= 1.0 + 1e-6)))
    # bf16 storage only perturbs low-order bits at these scales
    assert bool(jnp.allclose(mu16f, mu_r, rtol=5e-2, atol=5e-2))

    print("KERNEL_OK")
</pallas_src>

<mosaic_0001>
module attributes {stable_mosaic.version = 11 : i64} {
  func.func @kernel(%arg0: i32, %arg1: i32, %arg2: memref<16x32xf32, #tpu.memory_space<vmem>>, %arg3: memref<16x2xi32, #tpu.memory_space<vmem>>, %arg4: memref<32x128xf32, #tpu.memory_space<vmem>>, %arg5: memref<2x128xf32, #tpu.memory_space<vmem>>, %arg6: memref<3x128xf32, #tpu.memory_space<vmem>>, %arg7: memref<1x128xf32, #tpu.memory_space<vmem>>, %arg8: memref<3x128x128xf32, #tpu.memory_space<vmem>>, %arg9: memref<3x1x128xf32, #tpu.memory_space<vmem>>, %arg10: memref<3x16x128xf32, #tpu.memory_space<vmem>>) attributes {dimension_semantics = [#tpu.dimension_semantics<parallel>, #tpu.dimension_semantics<parallel>], iteration_bounds = array<i64: 1, 2>, scalar_prefetch = 0 : i64, scratch_operands = 0 : i64, tpu.core_type = #tpu.core_type<tc>, window_params = [{transform_indices = @transform_0, window_bounds = array<i64: 16, 32>}, {transform_indices = @transform_1, window_bounds = array<i64: 16, 2>}, {pipeline_mode = #tpu.pipeline_mode<synchronous>, transform_indices = @transform_2, window_bounds = array<i64: 32, 128>}, {pipeline_mode = #tpu.pipeline_mode<synchronous>, transform_indices = @transform_3, window_bounds = array<i64: 2, 128>}, {pipeline_mode = #tpu.pipeline_mode<synchronous>, transform_indices = @transform_4, window_bounds = array<i64: 3, 128>}, {pipeline_mode = #tpu.pipeline_mode<synchronous>, transform_indices = @transform_5, window_bounds = array<i64: 1, 128>}, {transform_indices = @transform_6, window_bounds = array<i64: 3, 128, 128>}, {transform_indices = @transform_7, window_bounds = array<i64: 3, 1, 128>}, {transform_indices = @transform_8, window_bounds = array<i64: 3, 16, 128>}]} {
    %c0 = arith.constant 0 : index
    %c0_0 = arith.constant 0 : index
    %0 = vector.load %arg2[%c0, %c0_0] : memref<16x32xf32, #tpu.memory_space<vmem>>, vector<16x32xf32>
    %c0_1 = arith.constant 0 : index
    %c0_2 = arith.constant 0 : index
    %1 = vector.load %arg4[%c0_1, %c0_2] : memref<32x128xf32, #tpu.memory_space<vmem>>, vector<32x128xf32>
    %cst = arith.constant dense<0.000000e+00> : vector<16x128xf32>
    %2 = tpu.matmul %0, %1, %cst {dimension_numbers = #tpu.dot_dimension_numbers<[1], [0], [0], [1], [0, 0, 1, 1], [], []>} : vector<16x32xf32>, vector<32x128xf32>, vector<16x128xf32> -> vector<16x128xf32>
    %c0_3 = arith.constant 0 : index
    %c0_4 = arith.constant 0 : index
    %3 = vector.load %arg7[%c0_3, %c0_4] : memref<1x128xf32, #tpu.memory_space<vmem>>, vector<1x128xf32>
    %4 = vector.broadcast %3 : vector<1x128xf32> to vector<16x128xf32>
    %5 = arith.addf %2, %4 : vector<16x128xf32>
    %c0_5 = arith.constant 0 : index
    %c0_6 = arith.constant 0 : index
    %6 = vector.load %arg3[%c0_5, %c0_6] : memref<16x2xi32, #tpu.memory_space<vmem>>, vector<16x2xi32>
    %c0_7 = arith.constant 0 : index
    %c0_8 = arith.constant 0 : index
    %7 = vector.load %arg5[%c0_7, %c0_8] : memref<2x128xf32, #tpu.memory_space<vmem>>, vector<2x128xf32>
    %8 = vector.extract_strided_slice %6 {offsets = [0, 0], sizes = [16, 1], strides = [1, 1]} : vector<16x2xi32> to vector<16x1xi32>
    %c0_i32 = arith.constant 0 : i32
    %9 = vector.broadcast %c0_i32 : i32 to vector<16x1xi32>
    %10 = arith.cmpi eq, %8, %9 : vector<16x1xi32>
    %11 = vector.extract_strided_slice %7 {offsets = [0, 0], sizes = [1, 128], strides = [1, 1]} : vector<2x128xf32> to vector<1x128xf32>
    %cst_9 = arith.constant 0.000000e+00 : f32
    %12 = vector.shape_cast %10 : vector<16x1xi1> to vector<16x1xi1>
    %13 = vector.broadcast %12 : vector<16x1xi1> to vector<16x128xi1>
    %14 = vector.shape_cast %11 : vector<1x128xf32> to vector<1x128xf32>
    %15 = vector.broadcast %14 : vector<1x128xf32> to vector<16x128xf32>
    %16 = vector.broadcast %cst_9 : f32 to vector<16x128xf32>
    %17 = arith.select %13, %15, %16 : vector<16x128xi1>, vector<16x128xf32>
    %18 = arith.addf %5, %17 : vector<16x128xf32>
    %c1_i32 = arith.constant 1 : i32
    %19 = vector.broadcast %c1_i32 : i32 to vector<16x1xi32>
    %20 = arith.cmpi eq, %8, %19 : vector<16x1xi32>
    %21 = vector.extract_strided_slice %7 {offsets = [1, 0], sizes = [1, 128], strides = [1, 1]} : vector<2x128xf32> to vector<1x128xf32>
    %cst_10 = arith.constant 0.000000e+00 : f32
    %22 = vector.shape_cast %20 : vector<16x1xi1> to vector<16x1xi1>
    %23 = vector.broadcast %22 : vector<16x1xi1> to vector<16x128xi1>
    %24 = vector.shape_cast %21 : vector<1x128xf32> to vector<1x128xf32>
    %25 = vector.broadcast %24 : vector<1x128xf32> to vector<16x128xf32>
    %26 = vector.broadcast %cst_10 : f32 to vector<16x128xf32>
    %27 = arith.select %23, %25, %26 : vector<16x128xi1>, vector<16x128xf32>
    %28 = arith.addf %18, %27 : vector<16x128xf32>
    %c0_11 = arith.constant 0 : index
    %c0_12 = arith.constant 0 : index
    %29 = vector.load %arg6[%c0_11, %c0_12] : memref<3x128xf32, #tpu.memory_space<vmem>>, vector<3x128xf32>
    %30 = vector.extract_strided_slice %6 {offsets = [0, 1], sizes = [16, 1], strides = [1, 1]} : vector<16x2xi32> to vector<16x1xi32>
    %c0_i32_13 = arith.constant 0 : i32
    %31 = vector.broadcast %c0_i32_13 : i32 to vector<16x1xi32>
    %32 = arith.cmpi eq, %30, %31 : vector<16x1xi32>
    %33 = vector.extract_strided_slice %29 {offsets = [0, 0], sizes = [1, 128], strides = [1, 1]} : vector<3x128xf32> to vector<1x128xf32>
    %cst_14 = arith.constant 0.000000e+00 : f32
    %34 = vector.shape_cast %32 : vector<16x1xi1> to vector<16x1xi1>
    %35 = vector.broadcast %34 : vector<16x1xi1> to vector<16x128xi1>
    %36 = vector.shape_cast %33 : vector<1x128xf32> to vector<1x128xf32>
    %37 = vector.broadcast %36 : vector<1x128xf32> to vector<16x128xf32>
    %38 = vector.broadcast %cst_14 : f32 to vector<16x128xf32>
    %39 = arith.select %35, %37, %38 : vector<16x128xi1>, vector<16x128xf32>
    %40 = arith.addf %28, %39 : vector<16x128xf32>
    %c1_i32_15 = arith.constant 1 : i32
    %41 = vector.broadcast %c1_i32_15 : i32 to vector<16x1xi32>
    %42 = arith.cmpi eq, %30, %41 : vector<16x1xi32>
    %43 = vector.extract_strided_slice %29 {offsets = [1, 0], sizes = [1, 128], strides = [1, 1]} : vector<3x128xf32> to vector<1x128xf32>
    %cst_16 = arith.constant 0.000000e+00 : f32
    %44 = vector.shape_cast %42 : vector<16x1xi1> to vector<16x1xi1>
    %45 = vector.broadcast %44 : vector<16x1xi1> to vector<16x128xi1>
    %46 = vector.shape_cast %43 : vector<1x128xf32> to vector<1x128xf32>
    %47 = vector.broadcast %46 : vector<1x128xf32> to vector<16x128xf32>
    %48 = vector.broadcast %cst_16 : f32 to vector<16x128xf32>
    %49 = arith.select %45, %47, %48 : vector<16x128xi1>, vector<16x128xf32>
    %50 = arith.addf %40, %49 : vector<16x128xf32>
    %c2_i32 = arith.constant 2 : i32
    %51 = vector.broadcast %c2_i32 : i32 to vector<16x1xi32>
    %52 = arith.cmpi eq, %30, %51 : vector<16x1xi32>
    %53 = vector.extract_strided_slice %29 {offsets = [2, 0], sizes = [1, 128], strides = [1, 1]} : vector<3x128xf32> to vector<1x128xf32>
    %cst_17 = arith.constant 0.000000e+00 : f32
    %54 = vector.shape_cast %52 : vector<16x1xi1> to vector<16x1xi1>
    %55 = vector.broadcast %54 : vector<16x1xi1> to vector<16x128xi1>
    %56 = vector.shape_cast %53 : vector<1x128xf32> to vector<1x128xf32>
    %57 = vector.broadcast %56 : vector<1x128xf32> to vector<16x128xf32>
    %58 = vector.broadcast %cst_17 : f32 to vector<16x128xf32>
    %59 = arith.select %55, %57, %58 : vector<16x128xi1>, vector<16x128xf32>
    %60 = arith.addf %50, %59 : vector<16x128xf32>
    %cst_18 = arith.constant 0.000000e+00 : f32
    %61 = vector.broadcast %cst_18 : f32 to vector<16x128xf32>
    %62 = arith.maximumf %60, %61 : vector<16x128xf32>
    %c0_19 = arith.constant 0 : index
    %c0_20 = arith.constant 0 : index
    %c0_21 = arith.constant 0 : index
    %63 = vector.load %arg8[%c0_19, %c0_20, %c0_21] : memref<3x128x128xf32, #tpu.memory_space<vmem>>, vector<1x128x128xf32>
    %64 = vector.shape_cast %63 : vector<1x128x128xf32> to vector<128x128xf32>
    %cst_22 = arith.constant dense<0.000000e+00> : vector<16x128xf32>
    %65 = tpu.matmul %62, %64, %cst_22 {dimension_numbers = #tpu.dot_dimension_numbers<[1], [0], [0], [1], [0, 0, 1, 1], [], []>} : vector<16x128xf32>, vector<128x128xf32>, vector<16x128xf32> -> vector<16x128xf32>
    %c0_23 = arith.constant 0 : index
    %c0_24 = arith.constant 0 : index
    %c0_25 = arith.constant 0 : index
    %66 = vector.load %arg9[%c0_23, %c0_24, %c0_25] : memref<3x1x128xf32, #tpu.memory_space<vmem>>, vector<1x1x128xf32>
    %67 = vector.shape_cast %66 : vector<1x1x128xf32> to vector<1x128xf32>
    %68 = vector.broadcast %67 : vector<1x128xf32> to vector<16x128xf32>
    %69 = arith.addf %65, %68 : vector<16x128xf32>
    %cst_26 = arith.constant 0.000000e+00 : f32
    %70 = vector.broadcast %cst_26 : f32 to vector<16x128xf32>
    %71 = arith.maximumf %69, %70 : vector<16x128xf32>
    %72 = math.absf %69 : vector<16x128xf32>
    %cst_27 = arith.constant 0.000000e+00 : f32
    %73 = vector.broadcast %cst_27 : f32 to vector<16x128xf32>
    %74 = arith.subf %73, %72 : vector<16x128xf32>
    %75 = math.exp %74 : vector<16x128xf32>
    %76 = math.log1p %75 : vector<16x128xf32>
    %77 = arith.addf %71, %76 : vector<16x128xf32>
    %c0_28 = arith.constant 0 : index
    %c0_29 = arith.constant 0 : index
    %c0_30 = arith.constant 0 : index
    %78 = vector.load %arg10[%c0_28, %c0_29, %c0_30] : memref<3x16x128xf32, #tpu.memory_space<vmem>>, vector<1x16x128xf32>
    %79 = vector.shape_cast %78 : vector<1x16x128xf32> to vector<16x128xf32>
    %80 = vector.shape_cast %77 : vector<16x128xf32> to vector<1x16x128xf32>
    tpu.vector_store %arg10[%c0_28, %c0_29, %c0_30], %80 {strides = array<i32>} : memref<3x16x128xf32, #tpu.memory_space<vmem>>, vector<1x16x128xf32>,
    %c1 = arith.constant 1 : index
    %c0_31 = arith.constant 0 : index
    %c0_32 = arith.constant 0 : index
    %81 = vector.load %arg8[%c1, %c0_31, %c0_32] : memref<3x128x128xf32, #tpu.memory_space<vmem>>, vector<1x128x128xf32>
    %82 = vector.shape_cast %81 : vector<1x128x128xf32> to vector<128x128xf32>
    %cst_33 = arith.constant dense<0.000000e+00> : vector<16x128xf32>
    %83 = tpu.matmul %62, %82, %cst_33 {dimension_numbers = #tpu.dot_dimension_numbers<[1], [0], [0], [1], [0, 0, 1, 1], [], []>} : vector<16x128xf32>, vector<128x128xf32>, vector<16x128xf32> -> vector<16x128xf32>
    %c1_34 = arith.constant 1 : index
    %c0_35 = arith.constant 0 : index
    %c0_36 = arith.constant 0 : index
    %84 = vector.load %arg9[%c1_34, %c0_35, %c0_36] : memref<3x1x128xf32, #tpu.memory_space<vmem>>, vector<1x1x128xf32>
    %85 = vector.shape_cast %84 : vector<1x1x128xf32> to vector<1x128xf32>
    %86 = vector.broadcast %85 : vector<1x128xf32> to vector<16x128xf32>
    %87 = arith.addf %83, %86 : vector<16x128xf32>
    %cst_37 = arith.constant 5.000000e-01 : f32
    %88 = vector.broadcast %cst_37 : f32 to vector<16x128xf32>
    %89 = arith.mulf %88, %87 : vector<16x128xf32>
    %90 = math.tanh %89 : vector<16x128xf32>
    %cst_38 = arith.constant 1.000000e+00 : f32
    %91 = vector.broadcast %cst_38 : f32 to vector<16x128xf32>
    %92 = arith.addf %90, %91 : vector<16x128xf32>
    %cst_39 = arith.constant 5.000000e-01 : f32
    %93 = vector.broadcast %cst_39 : f32 to vector<16x128xf32>
    %94 = arith.mulf %93, %92 : vector<16x128xf32>
    %c1_40 = arith.constant 1 : index
    %c0_41 = arith.constant 0 : index
    %c0_42 = arith.constant 0 : index
    %95 = vector.load %arg10[%c1_40, %c0_41, %c0_42] : memref<3x16x128xf32, #tpu.memory_space<vmem>>, vector<1x16x128xf32>
    %96 = vector.shape_cast %95 : vector<1x16x128xf32> to vector<16x128xf32>
    %97 = vector.shape_cast %94 : vector<16x128xf32> to vector<1x16x128xf32>
    tpu.vector_store %arg10[%c1_40, %c0_41, %c0_42], %97 {strides = array<i32>} : memref<3x16x128xf32, #tpu.memory_space<vmem>>, vector<1x16x128xf32>,
    %c2 = arith.constant 2 : index
    %c0_43 = arith.constant 0 : index
    %c0_44 = arith.constant 0 : index
    %98 = vector.load %arg8[%c2, %c0_43, %c0_44] : memref<3x128x128xf32, #tpu.memory_space<vmem>>, vector<1x128x128xf32>
    %99 = vector.shape_cast %98 : vector<1x128x128xf32> to vector<128x128xf32>
    %cst_45 = arith.constant dense<0.000000e+00> : vector<16x128xf32>
    %100 = tpu.matmul %62, %99, %cst_45 {dimension_numbers = #tpu.dot_dimension_numbers<[1], [0], [0], [1], [0, 0, 1, 1], [], []>} : vector<16x128xf32>, vector<128x128xf32>, vector<16x128xf32> -> vector<16x128xf32>
    %c2_46 = arith.constant 2 : index
    %c0_47 = arith.constant 0 : index
    %c0_48 = arith.constant 0 : index
    %101 = vector.load %arg9[%c2_46, %c0_47, %c0_48] : memref<3x1x128xf32, #tpu.memory_space<vmem>>, vector<1x1x128xf32>
    %102 = vector.shape_cast %101 : vector<1x1x128xf32> to vector<1x128xf32>
    %103 = vector.broadcast %102 : vector<1x128xf32> to vector<16x128xf32>
    %104 = arith.addf %100, %103 : vector<16x128xf32>
    %cst_49 = arith.constant 0.000000e+00 : f32
    %105 = vector.broadcast %cst_49 : f32 to vector<16x128xf32>
    %106 = arith.maximumf %104, %105 : vector<16x128xf32>
    %107 = math.absf %104 : vector<16x128xf32>
    %cst_50 = arith.constant 0.000000e+00 : f32
    %108 = vector.broadcast %cst_50 : f32 to vector<16x128xf32>
    %109 = arith.subf %108, %107 : vector<16x128xf32>
    %110 = math.exp %109 : vector<16x128xf32>
    %111 = math.log1p %110 : vector<16x128xf32>
    %112 = arith.addf %106, %111 : vector<16x128xf32>
    %c2_51 = arith.constant 2 : index
    %c0_52 = arith.constant 0 : index
    %c0_53 = arith.constant 0 : index
    %113 = vector.load %arg10[%c2_51, %c0_52, %c0_53] : memref<3x16x128xf32, #tpu.memory_space<vmem>>, vector<1x16x128xf32>
    %114 = vector.shape_cast %113 : vector<1x16x128xf32> to vector<16x128xf32>
    %115 = vector.shape_cast %112 : vector<16x128xf32> to vector<1x16x128xf32>
    tpu.vector_store %arg10[%c2_51, %c0_52, %c0_53], %115 {strides = array<i32>} : memref<3x16x128xf32, #tpu.memory_space<vmem>>, vector<1x16x128xf32>,
    return
  }
  func.func @transform_0(%arg0: i32, %arg1: i32) -> (i32, i32) {
    %c0_i32 = arith.constant 0 : i32
    %c0_i32_0 = arith.constant 0 : i32
    return %arg1, %c0_i32 : i32, i32
  }
  func.func @transform_1(%arg0: i32, %arg1: i32) -> (i32, i32) {
    %c0_i32 = arith.constant 0 : i32
    %c0_i32_0 = arith.constant 0 : i32
    return %arg1, %c0_i32 : i32, i32
  }
  func.func @transform_2(%arg0: i32, %arg1: i32) -> (i32, i32) {
    %c0_i32 = arith.constant 0 : i32
    %c0_i32_0 = arith.constant 0 : i32
    %c0_i32_1 = arith.constant 0 : i32
    return %c0_i32, %c0_i32_0 : i32, i32
  }
  func.func @transform_3(%arg0: i32, %arg1: i32) -> (i32, i32) {
    %c0_i32 = arith.constant 0 : i32
    %c0_i32_0 = arith.constant 0 : i32
    %c0_i32_1 = arith.constant 0 : i32
    return %c0_i32, %c0_i32_0 : i32, i32
  }
  func.func @transform_4(%arg0: i32, %arg1: i32) -> (i32, i32) {
    %c0_i32 = arith.constant 0 : i32
    %c0_i32_0 = arith.constant 0 : i32
    %c0_i32_1 = arith.constant 0 : i32
    return %c0_i32, %c0_i32_0 : i32, i32
  }
  func.func @transform_5(%arg0: i32, %arg1: i32) -> (i32, i32) {
    %c0_i32 = arith.constant 0 : i32
    %c0_i32_0 = arith.constant 0 : i32
    %c0_i32_1 = arith.constant 0 : i32
    return %c0_i32, %c0_i32_0 : i32, i32
  }
  func.func @transform_6(%arg0: i32, %arg1: i32) -> (i32, i32, i32) {
    %c0_i32 = arith.constant 0 : i32
    %c0_i32_0 = arith.constant 0 : i32
    %c0_i32_1 = arith.constant 0 : i32
    return %c0_i32, %c0_i32_0, %arg0 : i32, i32, i32
  }
  func.func @transform_7(%arg0: i32, %arg1: i32) -> (i32, i32, i32) {
    %c0_i32 = arith.constant 0 : i32
    %c0_i32_0 = arith.constant 0 : i32
    %c0_i32_1 = arith.constant 0 : i32
    return %c0_i32, %c0_i32_0, %arg0 : i32, i32, i32
  }
  func.func @transform_8(%arg0: i32, %arg1: i32) -> (i32, i32, i32) {
    %c0_i32 = arith.constant 0 : i32
    %c0_i32_0 = arith.constant 0 : i32
    return %c0_i32, %arg1, %arg0 : i32, i32, i32
  }
}

</mosaic_0001>

<bundles_post_ra>
// kernel: tpu_custom_call.1
= control target key start
LH: loop header
LB: loop body
LE: loop exit
PB: predicated region body
PF: predicated region fallthrough
CT: control target
= control target key end

     0   :  { %s1546_s0 = inlined_call_operand.vmem [shape: f32[32,32], index: 0, kind: input, shape index: {}]   ;;  %s1547_s1 = inlined_call_operand.vmem [shape: s32[32,2], index: 1, kind: input, shape index: {}]   ;;  %s1548_s2 = inlined_call_operand.hbm [shape: f32[32,128], index: 2, kind: input, shape index: {}]   ;;  %s1549_s3 = inlined_call_operand.hbm [shape: f32[2,128], index: 3, kind: input, shape index: {}]   ;;  %s1550_s4 = inlined_call_operand.vmem [shape: f32[3,128], index: 4, kind: input, shape index: {}]   ;;  %s1551_s5 = inlined_call_operand.hbm [shape: f32[1,128], index: 5, kind: input, shape index: {}]   ;;  %s1552_s6 = inlined_call_operand.hbm [shape: f32[3,128,128], index: 6, kind: input, shape index: {}]   ;;  %s1553_s7 = inlined_call_operand.vmem [shape: f32[3,1,128], index: 7, kind: input, shape index: {}]   ;;  %s1554_s8 = inlined_call_operand.hbm [shape: f32[3,32,128], index: 8, kind: output, shape index: {}]  }
   0x1   :  { %1558 = sst [smem:[#allocation21_spill]] %s1548_s2 }
   0x2   :  { %1559 = sst [smem:[#allocation22_spill]] %s1549_s3 }
   0x3   :  { %13 = vsyncpa [#allocation3], 0 }
   0x4   :  { %14 = vsyncpa [#allocation6], 0 }
   0x5   :  { %15 = vsyncpa [#allocation9], 0 }
   0x6   :  { %16 = vsyncpa [#allocation4], 0 }
   0x7   :  { %18 = vsyncpa [#allocation4 + $0x1], 0  ;;  %s1356_s27 = smov 0   ;;  %s1358_s28 = smov 0  }
   0x8   :  { %s1360_s29 = smov 0   ;;  %s1362_s30 = smov 0  }
   0x9   :  { %s1364_s9 = smov 0   ;;  %s1366_s10 = smov 0  }
   0xa LB: > { %1560 = sst [smem:[#allocation17_spill]] %s1282_s29  ;;  %s938_s11 = sadd.s32 4294967295, %s1294_s10   ;;  %s1294_s10 = sphi %s1366_s10, %s24_s10   ;;  %s1290_s9 = sphi %s1364_s9, %s1574_s9   ;;  %s1286_s30 = sphi %s1362_s30, %s1573_s30   ;;  %s1282_s29 = sphi %s1360_s29, %s1572_s29   ;;  %s1278_s28 = sphi %s1358_s28, %s1576_s28   ;;  %s1274_s27 = sphi %s1356_s27, %s1575_s27  }
   0xb   : > { %1561 = sst [smem:[#allocation18_spill]] %s1290_s9  ;;  %s939_s12 = sadd.s32 4294967294, %s1294_s10  }
   0xc   : > { %s33_s13 = sadd.s32 1, %s1290_s9  ;;  %s233_s14 = sadd.s32 1, %s1282_s29 }
   0xd   : > { %p34_p0 = scmp.ge.s32.totalorder %s33_s13, 2  ;;  %p243_p1 = scmp.ne.s32.totalorder %s1282_s29, %s1278_s28 }
   0xe   : > { %p244_p2 = scmp.eq.s32.totalorder %s938_s11, 1  ;;  %p249_p3 = scmp.ne.s32.totalorder %s1278_s28, %s1274_s27 }
   0xf   : > { %s1578_s13 = smov (%p34_p0, %s33_s13), 0  ;;  %p250_p5 = scmp.eq.s32.totalorder %s939_s12, 1 }
  0x10   : > { %1562 = sst [smem:[#allocation19_spill]] %s1578_s13  ;;  %p1396_p4 = por %p244_p2, %p243_p1 }
  0x11   : > { %s228_s16 = ssub.s32 %s1290_s9, %s1578_s13  ;;  %p940_p6 = scmp.ge.s32.totalorder %s1294_s10, 1 }
  0x12   : > { %p231_p7 = scmp.eq.s32.totalorder %s228_s16, 0  ;;  %p1403_p8 = por %p250_p5, %p249_p3 }
  0x13   : > { %p257_p9 = scmp.lt.s32.totalorder %s1294_s10, 3  ;;  %p1415_p11 = scmp.eq.s32.totalorder %s938_s11, 0 }
  0x14   : > { %s1409_s18 = scalar_select %p231_p7, %s1282_s29, %s233_s14  }
  0x15   : > { %p1411_p10 = pnand %p940_p6, %p257_p9  ;;  %s1568_s3 = sld [smem:[#allocation22_spill]] }
  0x16   : > { %1565 = sst [smem:[#allocation20_spill]] %s1409_s18  ;;  %s1296_s24 = smov [#allocation5]  }
  0x17   : > { %p994_p12 = pneg %p1411_p10  ;;  %s285_s25 = sshll.u32 %s1296_s24, 4  ;;  %s286_s25 = int_to_ptr.vmem [resolvable:$true] %s285_s25 }
  0x18   : > { %s1570_s2 = sld [smem:[#allocation21_spill]]  ;;  %s1297_s16 = smov [#allocation2]  }
  0x19   : > { %p1426_p13 = pnand %p1415_p11, %p994_p12  ;;  %s270_s21 = sshll.u32 %s1297_s16, 4  ;;  %s271_s21 = int_to_ptr.vmem [resolvable:$true] %s270_s21 }
  0x1a   : > { %s1298_s13 = smov 128   ;;  %s1299_s9 = smov 8  }
  0x1b   : > { %s283_s23 = sshll.u32 %s1568_s3, 4  ;;  %s298_s3 = sshll.u32 %s1551_s5, 4  ;;  %s284_s23 = int_to_ptr.hbm [resolvable:$true] %s283_s23  ;;  %s299_s3 = int_to_ptr.hbm [resolvable:$true] %s298_s3 }
  0x1c   : > { %1000 = dma.hbm_to_vmem [thread:$0]  (!%p1426_p13), %s284_s23, 32, %s286_s25, [#allocation6]  }
  0x1d   : > { %s1300_s18 = smov [#allocation7]   ;;  %s311_s29 = sshll.u32 %s1552_s6, 4  ;;  %s312_s29 = int_to_ptr.hbm [resolvable:$true] %s311_s29 }
  0x1e   : > { %s268_s14 = sshll.u32 %s1570_s2, 4  ;;  %s300_s11 = sshll.u32 %s1300_s18, 4  ;;  %s269_s14 = int_to_ptr.hbm [resolvable:$true] %s268_s14  ;;  %s301_s11 = int_to_ptr.vmem [resolvable:$true] %s300_s11 }
  0x1f   : > { %997 = dma.hbm_to_vmem [thread:$0]  (!%p1426_p13), %s269_s14, 512, %s271_s21, [#allocation3], %s1298_s13, %s1298_s13, %s1299_s9  }
  0x20   : > { %1003 = dma.hbm_to_vmem [thread:$0]  (!%p1426_p13), %s299_s3, 16, %s301_s11, [#allocation6]  }
  0x21   : > { %s1301_s23 = smov [#allocation8]   ;;  %353 = sbr.rel (%p1411_p10) target bundleno = 377 (0x179), region = 52 }
  0x22   : > { %s313_s25 = sshll.u32 %s1301_s23, 4  ;;  %s314_s25 = int_to_ptr.vmem [resolvable:$true] %s313_s25 }
  0x23   : > { %1006 = dma.hbm_to_vmem [thread:$0]  (!%p1426_p13), %s312_s29, 6144, %s314_s25, [#allocation9], %s1298_s13, %s1298_s13, %s1299_s9  }
  0x26   : > { %1257 = dma.done.wait (%p1415_p11), [#allocation3], 512  }
  0x27   : > { %1259 = vsyncadd (%p1415_p11), [#allocation3], 4294966784 }
  0x28   : > { %1261 = dma.done.wait (%p1415_p11), [#allocation6], 48  }
  0x29   : > { %1263 = vsyncadd (%p1415_p11), [#allocation6], 4294967248 }
  0x2a   : > { %1265 = dma.done.wait (%p1415_p11), [#allocation9], 6144  }
  0x2b   : > { %1267 = vsyncadd (%p1415_p11), [#allocation9], 4294961152  ;;  %s952_s2 = sshll.u32 %s1286_s30, 1  ;;  %v1302_v0 = vmov 1   ;;  %v1303_v1 = vmov 0   ;;  %v432_v2 = vld [vmem:[#allocation2 + $0x18] sm:$0xff] }
  0x2c   : > { %1084 = vset.pattern.permute.xlu1 %v1302_v0  ;;  %1083 = vset.pattern.permute.xlu0 %v1303_v1  ;;  %p412_p0 = scmp.lt.s32.totalorder %s952_s2, 3  ;;  %v431_v4 = vld [vmem:[#allocation2 + $0x10] sm:$0xff]  ;;  %v565_v7 = vld [vmem:[#allocation8 + $0x78] sm:$0xff]  ;;  %v430_v8 = vld [vmem:[#allocation2 + $0x8] sm:$0xff]  ;;  %vm437_vm3 = vcmask 261120   ;;  %s408_s16 = sand.u32 1, %s1278_s28  }
  0x2d   : > { %1085 = vset.pattern.permute.xlu2 %v1303_v1  ;;  %456 = vmatpush.msra.mxu0 %v432_v2  ;;  %v641_v9 = vld [vmem:[#allocation8 + $0xf8] sm:$0xff]  ;;  %v564_v19 = vld [vmem:[#allocation8 + $0x70] sm:$0xff]  ;;  %v563_v22 = vld [vmem:[#allocation8 + $0x68] sm:$0xff]  ;;  %s969_s25 = smul.u32 48, %s408_s16 }
  0x2e   : > { %s1580_s2 = smov (!%p412_p0, %s952_s2), 3  ;;  %v697_v10 = vld [vmem:[#allocation8 + $0x178] sm:$0xff]  ;;  %570 = vmatpush.msra.mxu1 %v565_v7  ;;  %647 = vmatpush.msra.mxu2 %v641_v9  ;;  %v640_v20 = vld [vmem:[#allocation8 + $0xf0] sm:$0xff]  ;;  %v639_v23 = vld [vmem:[#allocation8 + $0xe8] sm:$0xff] }
  0x2f   : > { %s953_s3 = sshll.u32 %s1580_s2, 3  ;;  %457 = vmatpush.msra.mxu0 %v431_v4  ;;  %v429_v12 = vld [vmem:[#allocation2] sm:$0xff]  ;;  %703 = vmatpush.msra.mxu3 %v697_v10  ;;  %v696_v21 = vld [vmem:[#allocation8 + $0x170] sm:$0xff]  ;;  %v695_v24 = vld [vmem:[#allocation8 + $0x168] sm:$0xff]  ;;  %s1492_s2 = scalar_lea.vmem [#allocation10], %s969_s25 }
  0x30   : > { %s421_s13 = scalar_lea.vmem %s1547_s1, %s953_s3  ;;  %s415_s20 = scalar_lea.vmem %s1546_s0, %s953_s3  ;;  %571 = vmatpush.msra.mxu1 %v564_v19  ;;  %648 = vmatpush.msra.mxu2 %v640_v20  ;;  %v562_v25 = vld [vmem:[#allocation8 + $0x60] sm:$0xff]  ;;  %v561_v28 = vld [vmem:[#allocation8 + $0x58] sm:$0xff]  ;;  %v560_v31 = vld [vmem:[#allocation8 + $0x50] sm:$0xff] }
  0x31   : > { %v467_v3 = vld [vmem:[%s421_s13] sm:$0xff]  ;;  %v468_v6 = vld [vmem:[%s421_s13 + $0x8] sm:$0xff]  ;;  %458 = vmatpush.msra.mxu0 %v430_v8  ;;  %704 = vmatpush.msra.mxu3 %v696_v21  ;;  %v636_v32 = vld [vmem:[#allocation8 + $0xd0] sm:$0xff]  ;;  %s760_s3 = scalar_lea.sflag [#allocation4], %s408_s16 }
  0x32   : > { %vm470_vm0 = vcmp.eq.s32.totalorder %v467_v3, 0  ;;  %vm471_vm1 = vcmp.eq.s32.totalorder %v468_v6, 0  ;;  %vm487_vm2 = vcmp.eq.s32.totalorder %v467_v3, 1  ;;  %v427_v13 = vld [vmem:[%s415_s20] sm:$0xff]  ;;  %vm531_vm4 = vcmp.eq.s32.totalorder %v467_v3, 2  ;;  %v428_v16 = vld [vmem:[%s415_s20 + $0x8] sm:$0xff]  ;;  %572 = vmatpush.msra.mxu1 %v563_v22  ;;  %649 = vmatpush.msra.mxu2 %v639_v23 }
  0x33   : > { %v472_v5 = vsel %vm470_vm0, 1, %v1303_v1  ;;  %v473_v11 = vsel %vm471_vm1, 1, %v1303_v1  ;;  %459 = vmatpush.msra.mxu0 %v429_v12  ;;  %v489_v14 = vsel %vm487_vm2, 1, %v1303_v1  ;;  %v533_v15 = vsel %vm531_vm4, 1, %v1303_v1  ;;  %v638_v26 = vld [vmem:[#allocation8 + $0xe0] sm:$0xff]  ;;  %705 = vmatpush.msra.mxu3 %v695_v24  ;;  %v637_v29 = vld [vmem:[#allocation8 + $0xd8] sm:$0xff] }
  0x34   : > { %506 = vperm.xlu1 %1084, %v472_v5   ;;  %475 = vperm.xlu0 %1083, %v472_v5   ;;  %vm488_vm5 = vcmp.eq.s32.totalorder %v468_v6, 1  ;;  %vm532_vm6 = vcmp.eq.s32.totalorder %v468_v6, 2  ;;  %v694_v27 = vld [vmem:[#allocation8 + $0x160] sm:$0xff]  ;;  %v693_v30 = vld [vmem:[#allocation8 + $0x158] sm:$0xff]  ;;  %v692_v33 = vld [vmem:[#allocation8 + $0x150] sm:$0xff] }
  0x35   : > { %478 = vperm.xlu2 %1085, %v473_v11   ;;  %956 = vmatmul.msk.f32.vlgmr.msra.gmra.mxu0 %vm437_vm3, %v427_v13  ;;  %v490_v17 = vsel %vm488_vm5, 1, %v1303_v1  ;;  %v534_v18 = vsel %vm532_vm6, 1, %v1303_v1  ;;  %v559_v34 = vld [vmem:[#allocation8 + $0x48] sm:$0xff]  ;;  %v558_v37 = vld [vmem:[#allocation8 + $0x40] sm:$0xff]  ;;  %v557_v40 = vld [vmem:[#allocation8 + $0x38] sm:$0xff] }
  0x36   : > { %573 = vmatpush.msra.mxu1 %v562_v25  ;;  %650 = vmatpush.msra.mxu2 %v638_v26  ;;  %v635_v35 = vld [vmem:[#allocation8 + $0xc8] sm:$0xff]  ;;  %v634_v38 = vld [vmem:[#allocation8 + $0xc0] sm:$0xff]  ;;  %v633_v41 = vld [vmem:[#allocation8 + $0xb8] sm:$0xff] }
  0x37   : > { %706 = vmatpush.msra.mxu3 %v694_v27  ;;  %v691_v36 = vld [vmem:[#allocation8 + $0x148] sm:$0xff]  ;;  %v690_v39 = vld [vmem:[#allocation8 + $0x140] sm:$0xff]  ;;  %v689_v42 = vld [vmem:[#allocation8 + $0x138] sm:$0xff] }
  0x38   : > { %574 = vmatpush.msra.mxu1 %v561_v28  ;;  %651 = vmatpush.msra.mxu2 %v637_v29  ;;  %v556_v43 = vld [vmem:[#allocation8 + $0x30] sm:$0xff]  ;;  %v555_v46 = vld [vmem:[#allocation8 + $0x28] sm:$0xff]  ;;  %v554_v49 = vld [vmem:[#allocation8 + $0x20] sm:$0xff] }
  0x39   : > { %707 = vmatpush.msra.mxu3 %v693_v30  ;;  %v632_v44 = vld [vmem:[#allocation8 + $0xb0] sm:$0xff]  ;;  %v631_v47 = vld [vmem:[#allocation8 + $0xa8] sm:$0xff]  ;;  %v630_v50 = vld [vmem:[#allocation8 + $0xa0] sm:$0xff] }
  0x3a   : > { %575 = vmatpush.msra.mxu1 %v560_v31  ;;  %652 = vmatpush.msra.mxu2 %v636_v32  ;;  %v688_v45 = vld [vmem:[#allocation8 + $0x130] sm:$0xff]  ;;  %v687_v48 = vld [vmem:[#allocation8 + $0x128] sm:$0xff]  ;;  %v686_v51 = vld [vmem:[#allocation8 + $0x120] sm:$0xff] }
  0x3b   : > { %708 = vmatpush.msra.mxu3 %v692_v33  ;;  %v553_v52 = vld [vmem:[#allocation8 + $0x18] sm:$0xff]  ;;  %v552_v55 = vld [vmem:[#allocation8 + $0x10] sm:$0xff]  ;;  %v551_v58 = vld [vmem:[#allocation8 + $0x8] sm:$0xff] }
  0x3c   : > { %519 = vperm.xlu1 %1084, %v489_v14   ;;  %492 = vperm.xlu0 %1083, %v489_v14   ;;  %v629_v53 = vld [vmem:[#allocation8 + $0x98] sm:$0xff]  ;;  %v628_v56 = vld [vmem:[#allocation8 + $0x90] sm:$0xff]  ;;  %v627_v59 = vld [vmem:[#allocation8 + $0x88] sm:$0xff] }
  0x3d   : > { %1086 = vset.pattern.permute.xlu2 %v1302_v0  ;;  %957 = vmatmul.msk.f32.gmra.mxu0 %vm437_vm3, %v428_v16  ;;  %v685_v54 = vld [vmem:[#allocation8 + $0x118] sm:$0xff]  ;;  %v684_v57 = vld [vmem:[#allocation8 + $0x110] sm:$0xff]  ;;  %v683_v60 = vld [vmem:[#allocation8 + $0x108] sm:$0xff] }
  0x3e   : > { %536 = vperm.xlu2 %1086, %v533_v15   ;;  %576 = vmatpush.msra.mxu1 %v559_v34  ;;  %v550_v61 = vld [vmem:[#allocation8] sm:$0xff]  ;;  %v469_v4 = vld [vmem:[#allocation5] sm:$0x3]  ;;  %v1088_v5 = vld [vmem:[#allocation7] ss:$0 sm:$0xff] }
  0x3f   : > { %653 = vmatpush.msra.mxu2 %v635_v35  ;;  %709 = vmatpush.msra.mxu3 %v691_v36  ;;  %v626_v62 = vld [vmem:[#allocation8 + $0x80] sm:$0xff]  ;;  %v482_v6 = vperm.slane %v469_v4, 0  ;;  %v504_v8 = vld [vmem:[%s1550_s4] sm:$0x7]  ;;  %v499_v9 = vperm.slane %v469_v4, 1 }
  0x40   : > { %577 = vmatpush.msra.mxu1 %v558_v37  ;;  %v682_v63 = vld [vmem:[#allocation8 + $0x100] sm:$0xff]  ;;  %v513_v13 = vperm.slane %v504_v8, 0  ;;  %v543_v21 = vperm.slane %v504_v8, 2 }
  0x41   : > { %654 = vmatpush.msra.mxu2 %v634_v38  ;;  %710 = vmatpush.msra.mxu3 %v690_v39 }
  0x42   : > { %578 = vmatpush.msra.mxu1 %v557_v40 }
  0x43   : > { %655 = vmatpush.msra.mxu2 %v633_v41  ;;  %711 = vmatpush.msra.mxu3 %v689_v42 }
  0x44   : > { %509 = vperm.xlu1 %1084, %v473_v11   ;;  %495 = vperm.xlu0 %1083, %v490_v17  }
  0x45   : > { %579 = vmatpush.msra.mxu1 %v556_v43  ;;  %656 = vmatpush.msra.mxu2 %v632_v44  ;;  %v1089_v44 = vld [vmem:[%s1553_s7] ss:$0 sm:$0xff] }
  0x46   : > { %522 = vperm.xlu2 %1086, %v490_v17   ;;  %712 = vmatpush.msra.mxu3 %v688_v45  ;;  %v526_v17 = vperm.slane %v504_v8, 1 }
  0x47   : > { %580 = vmatpush.msra.mxu1 %v555_v46  ;;  %657 = vmatpush.msra.mxu2 %v631_v47 }
  0x48   : > { %713 = vmatpush.msra.mxu3 %v687_v48  ;;  %v1090_v48 = vld [vmem:[%s1553_s7 + $0x1] ss:$0 sm:$0xff] }
  0x49   : > { %581 = vmatpush.msra.mxu1 %v554_v49  ;;  %658 = vmatpush.msra.mxu2 %v630_v50  ;;  %v1091_v49 = vld [vmem:[%s1553_s7 + $0x2] ss:$0 sm:$0xff] }
  0x4a   : > { %714 = vmatpush.msra.mxu3 %v686_v51 }
  0x4b   : > { %582 = vmatpush.msra.mxu1 %v553_v52  ;;  %659 = vmatpush.msra.mxu2 %v629_v53 }
  0x4c   : > { %1087 = vset.pattern.permute.xlu0 %v1302_v0  ;;  %715 = vmatpush.msra.mxu3 %v685_v54 }
  0x4d   : > { %539 = vperm.xlu0 %1087, %v534_v18   ;;  %583 = vmatpush.msra.mxu1 %v552_v55 }
  0x4e   : > { %660 = vmatpush.msra.mxu2 %v628_v56  ;;  %716 = vmatpush.msra.mxu3 %v684_v57 }
  0x4f   : > { %584 = vmatpush.msra.mxu1 %v551_v58 }
  0x50   : > { %661 = vmatpush.msra.mxu2 %v627_v59  ;;  %717 = vmatpush.msra.mxu3 %v683_v60 }
  0x51   : > { %585 = vmatpush.msra.mxu1 %v550_v61 }
  0x52   : > { %662 = vmatpush.msra.mxu2 %v626_v62  ;;  %718 = vmatpush.msra.mxu3 %v682_v63 }
  0x8f   : > { %v479_v2 = vpop.permute.xlu2 %478 }
  0x90   : > { %vm481_vm11 = vcmp.eq.s32.totalorder %v479_v2, 1 }
  0x91   : > { %v484_v28 = vsel %vm481_vm11, %v482_v6, 0.0 }
  0x98   : > { %v537_v10 = vpop.permute.xlu2 %536 }
  0x99   : > { %vm541_vm12 = vcmp.eq.s32.totalorder %v537_v10, 1 }
  0x9a   : > { %v544_v29 = vsel %vm541_vm12, %v543_v21, 0.0 }
  0xa0   : > { %v523_v30 = vpop.permute.xlu2 %522 }
  0xa1   : > { %vm525_vm15 = vcmp.eq.s32.totalorder %v523_v30, 1 }
  0xa2   : > { %v528_v39 = vsel %vm525_vm15, %v526_v17, 0.0 }
  0xa6   : > { %v476_v0 = vpop.permute.xlu0 %475  ;;  %v507_v1 = vpop.permute.xlu1 %506 }
  0xa7   : > { %vm480_vm7 = vcmp.eq.s32.totalorder %v476_v0, 1  ;;  %vm511_vm9 = vcmp.eq.s32.totalorder %v507_v1, 1 }
  0xa8   : > { %v483_v14 = vsel %vm480_vm7, %v482_v6, 0.0  ;;  %v514_v20 = vsel %vm511_vm9, %v513_v13, 0.0 }
  0xae   : > { %v493_v3 = vpop.permute.xlu0 %492  ;;  %v520_v7 = vpop.permute.xlu1 %519 }
  0xaf   : > { %vm497_vm8 = vcmp.eq.s32.totalorder %v493_v3, 1  ;;  %vm524_vm10 = vcmp.eq.s32.totalorder %v520_v7, 1 }
  0xb0   : > { %v500_v18 = vsel %vm497_vm8, %v499_v9, 0.0  ;;  %v527_v23 = vsel %vm524_vm10, %v526_v17, 0.0 }
  0xb2   : > { %v461_v11 = vpop.f32.mrf.mxu0 }
  0xb3   : > { %v462_v12 = vadd.f32 %v1088_v5, %v461_v11 }
  0xb5   : > { %v485_v16 = vadd.f32 %v483_v14, %v462_v12 }
  0xb6   : > { %v496_v15 = vpop.permute.xlu0 %495  ;;  %v510_v24 = vpop.permute.xlu1 %509 }
  0xb7   : > { %v502_v19 = vadd.f32 %v500_v18, %v485_v16  ;;  %vm498_vm13 = vcmp.eq.s32.totalorder %v496_v15, 1  ;;  %vm512_vm14 = vcmp.eq.s32.totalorder %v510_v24, 1 }
  0xb8   : > { %v501_v34 = vsel %vm498_vm13, %v499_v9, 0.0  ;;  %v515_v37 = vsel %vm512_vm14, %v513_v13, 0.0 }
  0xb9   : > { %v516_v22 = vadd.f32 %v514_v20, %v502_v19 }
  0xba   : > { %v464_v25 = vpop.f32.mrf.mxu0 }
  0xbb   : > { %v465_v26 = vadd.f32 %v1088_v5, %v464_v25  ;;  %v529_v27 = vadd.f32 %v527_v23, %v516_v22 }
  0xbd   : > { %v486_v32 = vadd.f32 %v484_v28, %v465_v26  ;;  %v546_v33 = vadd.f32 %v544_v29, %v529_v27 }
  0xbf   : > { %v540_v31 = vpop.permute.xlu0 %539  ;;  %v503_v35 = vadd.f32 %v501_v34, %v486_v32  ;;  %v548_v36 = vmax.f32 %v546_v33, 0.0 }
  0xc0   : > { %vm542_vm0 = vcmp.eq.s32.totalorder %v540_v31, 1 }
  0xc1   : > { %586 = vmatmul.f32.vlgmr.msra.gmra.mxu1 %v548_v36  ;;  %663 = vmatmul.f32.vlgmr.msra.gmra.mxu2 %v548_v36  ;;  %v517_v38 = vadd.f32 %v515_v37, %v503_v35  ;;  %v545_v40 = vsel %vm542_vm0, %v543_v21, 0.0 }
  0xc2   : > { %719 = vmatmul.f32.vlgmr.msra.gmra.mxu3 %v548_v36 }
  0xc3   : > { %v530_v41 = vadd.f32 %v528_v39, %v517_v38 }
  0xc5   : > { %v547_v42 = vadd.f32 %v545_v40, %v530_v41 }
  0xc7   : > { %v549_v43 = vmax.f32 %v547_v42, 0.0 }
  0xc9   : > { %589 = vmatmul.f32.gmra.mxu1 %v549_v43  ;;  %666 = vmatmul.f32.gmra.mxu2 %v549_v43 }
  0xca   : > { %722 = vmatmul.f32.gmra.mxu3 %v549_v43 }
 0x13e   : > { %v587_v45 = vpop.f32.mrf.mxu1 }
 0x13f   : > { %v588_v46 = vadd.f32 %v1089_v44, %v587_v45 }
 0x141   : > { %v595_v47 = vand.u32 2147483647, %v588_v46  ;;  %v593_v27 = vmax.f32 %v588_v46, 0.0 }
 0x143   : > { %v597_v50 = vsub.f32 0.0, %v595_v47 }
 0x144   : > { %v664_v51 = vpop.f32.mrf.mxu2 }
 0x145   : > { %v599_v52 = vmul.f32 1.442695, %v597_v50  ;;  %v665_v53 = vadd.f32 %v1090_v48, %v664_v51  ;;  %v720_v54 = vpop.f32.mrf.mxu3 }
 0x146   : > { %v1481_v55 = vadd.f32 %v1091_v49, %v720_v54  ;;  %v590_v56 = vpop.f32.mrf.mxu1 }
 0x147   : > { %1092 = vpow2.f32 %v599_v52  ;;  %v670_v57 = vmul.f32 0.5, %v665_v53  ;;  %v1483_v58 = vadd.f32 %v1089_v44, %v590_v56 }
 0x148   : > { %v728_v59 = vand.u32 2147483647, %v1481_v55  ;;  %v726_v41 = vmax.f32 %v1481_v55, 0.0 }
 0x149   : > { %1094 = vtanh.f32 %v670_v57  ;;  %v596_v60 = vand.u32 2147483647, %v1483_v58  ;;  %v594_v45 = vmax.f32 %v1483_v58, 0.0 }
 0x14a   : > { %v730_v61 = vsub.f32 0.0, %v728_v59 }
 0x14b   : > { %v598_v62 = vsub.f32 0.0, %v596_v60 }
 0x14c   : > { %v732_v63 = vmul.f32 1.442695, %v730_v61  ;;  %v667_v0 = vpop.f32.mrf.mxu2 }
 0x14d   : > { %v1093_v1 = vpop.eup %1092  ;;  %v601_v2 = vmul.f32 1.442695, %v598_v62  ;;  %v668_v3 = vadd.f32 %v1090_v48, %v667_v0  ;;  %v723_v4 = vpop.f32.mrf.mxu3 }
 0x14e   : > { %v603_v5 = vadd.f32 1.0, %v1093_v1  ;;  %1096 = vpow2.f32 %v732_v63  ;;  %v606_v7 = vmul.f32 -0.5, %v1093_v1  ;;  %v1489_v9 = vadd.f32 %v1091_v49, %v723_v4 }
 0x14f   : > { %v1095_v6 = vpop.eup %1094  ;;  %1098 = vpow2.f32 %v601_v2  ;;  %v671_v8 = vmul.f32 0.5, %v668_v3  ;;  %v609_v16 = vand.u32 2147483647, %v1093_v1 }
 0x150   : > { %1100 = vlog2.f32 %v603_v5  ;;  %v674_v10 = vadd.f32 1.0, %v1095_v6  ;;  %v729_v11 = vand.u32 2147483647, %v1489_v9  ;;  %v607_v13 = vadd.f32 1.0, %v606_v7 }
 0x151   : > { %1102 = vtanh.f32 %v671_v8  ;;  %vm610_vm1 = vcmp.lt.f32.partialorder %v609_v16, 0.0004427343  ;;  %v727_v56 = vmax.f32 %v1489_v9, 0.0 }
 0x152   : > { %v676_v12 = vmul.f32 0.5, %v674_v10  ;;  %v731_v14 = vsub.f32 0.0, %v729_v11  ;;  %v608_v25 = vmul.f32 %v1093_v1, %v607_v13 }
 0x154   : > { %v1097_v15 = vpop.eup %1096  ;;  %959 = vst [vmem:[%s1492_s2 + $0x10] sm:$0xff] %v676_v12  ;;  %v734_v19 = vmul.f32 1.442695, %v731_v14 }
 0x155   : > { %v1099_v17 = vpop.eup %1098  ;;  %v736_v18 = vadd.f32 1.0, %v1097_v15  ;;  %v739_v21 = vmul.f32 -0.5, %v1097_v15  ;;  %v742_v33 = vand.u32 2147483647, %v1097_v15 }
 0x156   : > { %v1101_v20 = vpop.eup %1100  ;;  %v612_v22 = vadd.f32 1.0, %v1099_v17  ;;  %v615_v26 = vmul.f32 -0.5, %v1099_v17  ;;  %v618_v35 = vand.u32 2147483647, %v1099_v17 }
 0x157   : > { %v1103_v23 = vpop.eup %1102  ;;  %v605_v24 = vmul.f32 0.6931472, %v1101_v20  ;;  %1104 = vlog2.f32 %v736_v18  ;;  %v740_v31 = vadd.f32 1.0, %v739_v21  ;;  %vm743_vm2 = vcmp.lt.f32.partialorder %v742_v33, 0.0004427343 }
 0x158   : > { %1106 = vlog2.f32 %v612_v22  ;;  %v675_v28 = vadd.f32 1.0, %v1103_v23  ;;  %v616_v34 = vadd.f32 1.0, %v615_v26  ;;  %vm619_vm3 = vcmp.lt.f32.partialorder %v618_v35, 0.0004427343 }
 0x159   : > { %v611_v29 = vsel %vm610_vm1, %v608_v25, %v605_v24  ;;  %1108 = vpow2.f32 %v734_v19  ;;  %v741_v39 = vmul.f32 %v1097_v15, %v740_v31 }
 0x15a   : > { %v621_v30 = vadd.f32 %v611_v29, %v593_v27  ;;  %v677_v32 = vmul.f32 0.5, %v675_v28  ;;  %v617_v43 = vmul.f32 %v1099_v17, %v616_v34 }
 0x15c   : > { %623 = vst [vmem:[%s1492_s2] sm:$0xff] %v621_v30 }
 0x15d   : > { %v1105_v36 = vpop.eup %1104  ;;  %960 = vst [vmem:[%s1492_s2 + $0x18] sm:$0xff] %v677_v32 }
 0x15e   : > { %v1107_v37 = vpop.eup %1106  ;;  %v738_v38 = vmul.f32 0.6931472, %v1105_v36 }
 0x15f   : > { %v1109_v40 = vpop.eup %1108  ;;  %v614_v42 = vmul.f32 0.6931472, %v1107_v37 }
 0x160   : > { %v744_v44 = vsel %vm743_vm2, %v741_v39, %v738_v38  ;;  %v745_v46 = vadd.f32 1.0, %v1109_v40  ;;  %v748_v49 = vmul.f32 -0.5, %v1109_v40  ;;  %v751_v52 = vand.u32 2147483647, %v1109_v40 }
 0x161   : > { %v754_v47 = vadd.f32 %v744_v44, %v726_v41  ;;  %v620_v48 = vsel %vm619_vm3, %v617_v43, %v614_v42 }
 0x162   : > { %v622_v50 = vadd.f32 %v620_v48, %v594_v45  ;;  %1110 = vlog2.f32 %v745_v46  ;;  %v749_v51 = vadd.f32 1.0, %v748_v49  ;;  %vm752_vm4 = vcmp.lt.f32.partialorder %v751_v52, 0.0004427343 }
 0x163   : > { %962 = vst [vmem:[%s1492_s2 + $0x20] sm:$0xff] %v754_v47 }
 0x164   : > { %624 = vst [vmem:[%s1492_s2 + $0x8] sm:$0xff] %v622_v50  ;;  %v750_v55 = vmul.f32 %v1109_v40, %v749_v51 }
 0x168   : > { %v1111_v53 = vpop.eup %1110 }
 0x169   : > { %v747_v54 = vmul.f32 0.6931472, %v1111_v53 }
 0x16b   : > { %v753_v57 = vsel %vm752_vm4, %v750_v55, %v747_v54 }
 0x16c   : > { %v755_v58 = vadd.f32 %v753_v57, %v727_v56 }
 0x16e   : > { %963 = vst [vmem:[%s1492_s2 + $0x28] sm:$0xff] %v755_v58 }
 0x16f   : > { %s968_s29 = sshll.u32 %s1286_s30, 4  ;;  %s783_s9 = sshll.u32 %s1492_s2, 4  ;;  %s784_s9 = int_to_ptr.vmem [resolvable:$true] %s783_s9 }
 0x170   : > { %s772_s19 = scalar_lea.hbm %s1554_s8, %s968_s29  ;;  %s1304_s26 = smov 256  }
 0x171   : > { %s785_s20 = sshll.u32 %s772_s19, 4  ;;  %986 = sst [smem:[#allocation12]] (%p1396_p4), %s1304_s26  ;;  %s786_s20 = int_to_ptr.hbm [resolvable:$true] %s785_s20 }
 0x172   : > { %s1305_s14 = smov 512   ;;  %s1306_s16 = smov 2  }
 0x173   : > { %987 = sst [smem:[#allocation12 + $0x1]] (%p1396_p4), %s1305_s14  ;;  %s1307_s30 = smov 128  }
 0x174   : > { %988 = sst [smem:[#allocation12 + $0x2]] (%p1396_p4), %s1306_s16  ;;  %s1308_s21 = smov 8  }
 0x175   : > { %989 = sst [smem:[#allocation12 + $0x3]] (%p1396_p4), %s1307_s30  ;;  %s1309_s22 = smov [#allocation11]  }
 0x176   : > { %990 = sst [smem:[#allocation12 + $0x4]] (%p1396_p4), %s1307_s30  ;;  %s1310_s24 = smov 0  }
 0x177   : > { %991 = sst [smem:[#allocation12 + $0x5]] (%p1396_p4), %s1308_s21 }
 0x178   : > { %992 = dma.general (%p1396_p4), %s784_s9, 768, %s786_s20, %s760_s3, %s1309_s22, [#allocation12], %s1310_s24, 0  }
 0x179 PF: > { %p1019_p1 = scmp.ge.s32.totalorder %s1294_s10, 2  ;;  %s813_s11 = sand.u32 1, %s1274_s27  }
 0x17a   : > { %s814_s12 = scalar_lea.sflag [#allocation4], %s813_s11 }
 0x17b   : > { %p1008_p2 = pnand %p1019_p1, %p1403_p8 }
 0x17d   : > { %p1009_p3 = pneg %p1008_p2 }
 0x17f   : > { %1269 = dma.done.wait (%p1009_p3), %s814_s12, 768  }
 0x180   : > { %1271 = vsyncadd (%p1009_p3), %s814_s12, 4294966528  ;;  %s24_s10 = sadd.s32 1, %s1294_s10   ;;  %s1571_s23 = sld [smem:[#allocation17_spill]] }
 0x181   : > { %p21_p5 = scmp.ge.s32.totalorder %s24_s10, 4   ;;  %s1572_s29 = sld [smem:[#allocation20_spill]] }
 0x182   : > { %s1573_s30 = sld [smem:[#allocation18_spill]]  ;;  %s1575_s27 = smov %s1278_s28 }
 0x183   : > { %s1574_s9 = sld [smem:[#allocation19_spill]]  ;;  %23 = sbr.rel (!%p21_p5) target bundleno = 10 (0xa), region = 122 }
 0x186   : > { %s1576_s28 = smov %s1571_s23 }
 0x188   :  { %820 = vsyncpa [#allocation3], 1 }
 0x189   :  { %822 = vsyncpa [#allocation3 + $0x1], 1 }
 0x18a   :  { %823 = vsyncpa [#allocation6], 1 }
 0x18b   :  { %824 = vsyncpa [#allocation9], 1 }
 0x18c   :  { %825 = vsyncpa [#allocation4], 1 }
 0x18d   :  { %827 = vsyncpa [#allocation4 + $0x1], 1 }

</bundles_post_ra>
